<compile_context>
chip_gen: v7x
topology: tpu7x:2x2x1
jax: 0.10.0
libtpu: 0.0.40
codegen_flags: <defaults>
</compile_context>

<pallas_src>
import functools

import numpy as np
import jax
import jax.numpy as jnp
from jax import lax
from jax.experimental import pallas as pl
from jax.experimental.pallas import tpu as pltpu

_LANE = 128


@functools.lru_cache(maxsize=None)
def _roll_matches_numpy():
    """One-time probe of pltpu.roll's shift convention (guards np.roll parity)."""
    def k(x_ref, o_ref):
        o_ref[...] = pltpu.roll(x_ref[...], 1, axis=0)
    x = jnp.arange(8 * 128, dtype=jnp.float32).reshape(8, 128)
    out = pl.pallas_call(k, out_shape=jax.ShapeDtypeStruct((8, 128), jnp.float32))(x)
    return bool(jnp.all(out == jnp.roll(x, 1, axis=0)))


def _basic_block_kernel(xc_ref, xh_ref, w1_ref, b1_ref, w2_ref, b2_ref, w3_ref,
                        *rest, TH, W, P, has_downsample, roll_fwd):
    """One grid step == one (row-tile, image).

    xc_ref: (1, 1, TH*W, Cin)  centre rows of the (stride-folded) input
    xh_ref: (1, 1, 2*W,  Cin)  image row above / below this tile (zero at borders)
    w1_ref: (Cin, P) or, with downsample, (Cin, 2P) = [conv1 | downsample] fused
    w2_ref: (3, 3P, P)         conv2 taps; the three kw taps merged on the K axis
    """
    if has_downsample:
        bds_ref, out_ref = rest
    else:
        (out_ref,) = rest

    S = (TH + 2) * W            # haloed rows of this tile, flattened
    THW = TH * W                # output rows of this tile, flattened
    cdt = xc_ref.dtype          # MXU compute dtype (bf16 in -> bf16 MXU path)

    t = pl.program_id(0)
    n_tiles = pl.num_programs(0)

    x_c = xc_ref[0, 0]          # (THW, Cin)
    x_h = xh_ref[0, 0]          # (2W, Cin)

    # conv1 (1x1, BN1 scale folded into w1).  The downsample 1x1(+BN) is fused into
    # the same matmul as extra output columns (fatter N for the 256-wide MXU).
    y1r = jnp.dot(x_c, w1_ref[...], preferred_element_type=jnp.float32)
    if has_downsample:
        y1c = jnp.maximum(y1r[:, :P] + b1_ref[...], 0.0)
        res = y1r[:, P:] + bds_ref[...]
    else:
        y1c = jnp.maximum(y1r + b1_ref[...], 0.0)
        res = x_c.astype(jnp.float32)          # identity residual (Cin == P)

    # conv1 on the two halo rows.  Rows that are conv2's zero padding (image
    # top/bottom) must be exactly 0, not relu(b1): mask just these 2W rows.
    w1c = w1_ref[:, :P] if has_downsample else w1_ref[...]
    y1h = jnp.maximum(
        jnp.dot(x_h, w1c, preferred_element_type=jnp.float32) + b1_ref[...], 0.0)
    rh = lax.broadcasted_iota(jnp.int32, (2 * W, 1), 0)
    keep = jnp.logical_and(jnp.logical_or(t > 0, rh >= W),
                           jnp.logical_or(t < n_tiles - 1, rh < W))
    y1h = jnp.where(keep, y1h, 0.0)

    # Haloed conv1 slab (S, P) = [row above | centre | row below].
    y1 = jnp.concatenate([y1h[:W], y1c, y1h[W:]], axis=0)

    # Column-boundary masks, then the +/-1-row shifts on the XLU (pltpu.roll).
    # The roll wrap rows are already zero: row 0 wraps to row S-1 (col W-1, masked
    # in yl) and row S-1 wraps to row 0 (col 0, masked in yr).
    col = lax.broadcasted_iota(jnp.int32, (S, 1), 0) % W
    yl = jnp.where(col == W - 1, 0.0, y1)       # feeds kw=0 taps (w-1 neighbours)
    yr = jnp.where(col == 0, 0.0, y1)           # feeds kw=2 taps (w+1 neighbours)
    sh = 1 if roll_fwd else S - 1               # positive shifts only
    v0 = pltpu.roll(yl, sh, axis=0)             # v0[i] = yl[i-1]
    v2 = pltpu.roll(yr, S - sh, axis=0)         # v2[i] = yr[i+1]
    lhs = jnp.concatenate(
        [v0.astype(cdt), y1.astype(cdt), v2.astype(cdt)], axis=1)   # (S, 3P)

    # conv2 (3x3, pad=1, BN2 scale folded) as three K=3P matmuls (one per kh);
    # the accumulator is seeded by the kh=0 dot instead of zeros+add.
    acc = jnp.dot(lhs[0:THW], w2_ref[0], preferred_element_type=jnp.float32)
    for kh in (1, 2):
        acc = acc + jnp.dot(lhs[kh * W:kh * W + THW], w2_ref[kh],
                            preferred_element_type=jnp.float32)
    y2 = jnp.maximum(acc + b2_ref[...], 0.0).astype(cdt)

    # conv3 (1x1, no BN) + residual + ReLU.
    y3 = jnp.dot(y2, w3_ref[...], preferred_element_type=jnp.float32)
    out_ref[0, 0] = jnp.maximum(res + y3, 0.0).astype(out_ref.dtype)


def _ceil_to(x, m):
    return (x + m - 1) // m * m


def _pad_to(a, shape):
    return jnp.pad(a, [(0, t - s) for s, t in zip(a.shape, shape)])


def _vmem_budget_bytes():
    """Per-generation VMEM budget: ~100 MiB on 128-MiB chips, ~52 MiB on v7x."""
    cap = 128 * 2**20
    try:
        cap = int(getattr(pltpu.get_tpu_info(), "vmem_capacity_bytes", cap))
    except Exception:                    # best-effort hardware query
        pass
    if cap >= 128 * 2**20:
        return 100 * 2**20               # v5e / v6e
    return max(min(cap - 12 * 2**20, 52 * 2**20), 16 * 2**20)   # v7x headroom


def _choose_row_tile(Ho, W, Cin, P, itemsize, resident_bytes, budget_bytes):
    """Largest divisor of Ho whose per-tile working set fits the VMEM budget."""
    best = 1
    for th in range(1, Ho + 1):
        if Ho % th:
            continue
        thw, s = th * W, (th + 2) * W
        blocks = 2 * (thw * Cin + 2 * W * Cin + thw * P) * itemsize   # dbl-buffered x/halo/out
        temps = (8 * s + 4 * thw) * P * 4                             # f32 in-kernel working set
        if resident_bytes + blocks + temps <= budget_bytes:
            best = th
    return best


def _wmap2(t, n):
    return (0, 0)


def _wmap3(t, n):
    return (0, 0, 0)


def basic_block_forward_nhwc(x_nhwc, params, stride=1, row_tile=None):
    """BasicBlock forward on NHWC input (channels on the TPU lane axis)."""
    # TODO(synk): at FPN scale the stride-fold slice below (and the NCHW<->NHWC
    # transposes in basic_block_forward) should be fused into the surrounding NHWC
    # pipeline / producing kernel to avoid extra HBM passes; kept here so the
    # interface matches the PyTorch module.
    xs = x_nhwc[:, ::stride, ::stride, :]
    N, Ho, Wo, Cin0 = xs.shape
    P0 = params["w1"].shape[1]
    has_ds = stride != 1
    if not has_ds:
        assert Cin0 == P0, "identity residual requires in_planes == planes when stride == 1"

    cdt = xs.dtype
    itemsize = xs.dtype.itemsize
    # Lane-dense channels: pad Cin/P to multiples of 128 (no-op at real FPN widths).
    Cin = _ceil_to(Cin0, _LANE)
    P = _ceil_to(P0, _LANE)
    # NOTE: Wo should be a multiple of 8 (true at FPN scales) so the kh-shifted
    # slices of the (S, 3P) buffer start on sublane-tile boundaries.

    # One-time parameter transform: fold BN scales into the conv weights, pad channel
    # dims, cast matmul operands to the input dtype, keep f32 biases.
    w1 = _pad_to(params["w1"] * params["s1"][0][None, :], (Cin, P))
    b1f = _pad_to(params["b1"], (1, P)).astype(jnp.float32)
    w2 = _pad_to(params["w2"] * params["s2"][0][None, None, None, :], (3, 3, P, P))
    w2f = w2.reshape(3, 3 * P, P).astype(cdt)
    b2f = _pad_to(params["b2"], (1, P)).astype(jnp.float32)
    w3f = _pad_to(params["w3"], (P, P)).astype(cdt)
    if has_ds:
        wds = _pad_to(params["wds"] * params["sds"][0][None, :], (Cin, P))
        w1f = jnp.concatenate([w1, wds], axis=1).astype(cdt)   # [conv1 | downsample]
        bdsf = _pad_to(params["bds"], (1, P)).astype(jnp.float32)
        weights = [w1f, b1f, w2f, b2f, w3f, bdsf]
    else:
        w1f = w1.astype(cdt)
        weights = [w1f, b1f, w2f, b2f, w3f]

    # TODO(synk): mark the constant weight/bias specs pipeline_mode=pl.Buffered(1)
    # once single-buffered operands are supported by the auto-pipeliner; budget them
    # as double-buffered for now.
    w_bytes = 2 * sum(int(np.prod(a.shape)) * a.dtype.itemsize for a in weights)

    budget = _vmem_budget_bytes()
    TH = row_tile if row_tile is not None else _choose_row_tile(
        Ho, Wo, Cin, P, itemsize, w_bytes, budget)
    assert Ho % TH == 0, f"row_tile {TH} must divide output height {Ho}"
    T = Ho // TH
    THW = TH * Wo

    if Cin != Cin0:
        xs = jnp.pad(xs, ((0, 0), (0, 0), (0, 0), (0, Cin - Cin0)))

    # Centre blocks: a pure reshape (no HBM copy).  Halo blocks: only the single
    # image row above/below each tile (zeros at the image border) -- 2/TH of the
    # input in extra HBM traffic instead of a full haloed copy.
    x_c = xs.reshape(N, T, THW, Cin)
    zrow = jnp.zeros((N, 1, Wo, Cin), cdt)
    above = jnp.concatenate([zrow, xs[:, TH - 1:Ho - 1:TH]], axis=1)   # (N, T, Wo, Cin)
    below = jnp.concatenate([xs[:, TH:Ho:TH], zrow], axis=1)           # (N, T, Wo, Cin)
    x_h = jnp.concatenate([above[:, :, None], below[:, :, None]], axis=2)
    x_h = x_h.reshape(N, T, 2 * Wo, Cin)

    in_arrays = [x_c, x_h] + weights
    in_specs = [
        pl.BlockSpec((1, 1, THW, Cin), lambda t, n: (n, t, 0, 0)),
        pl.BlockSpec((1, 1, 2 * Wo, Cin), lambda t, n: (n, t, 0, 0)),
        pl.BlockSpec(tuple(w1f.shape), _wmap2),
        pl.BlockSpec((1, P), _wmap2),
        pl.BlockSpec((3, 3 * P, P), _wmap3),
        pl.BlockSpec((1, P), _wmap2),
        pl.BlockSpec((P, P), _wmap2),
    ]
    if has_ds:
        in_specs.append(pl.BlockSpec((1, P), _wmap2))

    kernel = functools.partial(_basic_block_kernel, TH=TH, W=Wo, P=P,
                               has_downsample=has_ds,
                               roll_fwd=_roll_matches_numpy())

    out = pl.pallas_call(
        kernel,
        out_shape=jax.ShapeDtypeStruct((N, T, THW, P), cdt),
        grid_spec=pltpu.PrefetchScalarGridSpec(
            num_scalar_prefetch=0,
            # Row tiles first so the core-sharded parallel axis has extent >= 2
            # even for batch == 1 (v7x megacore); both axes are independent.
            grid=(T, N),
            in_specs=in_specs,
            out_specs=pl.BlockSpec((1, 1, THW, P), lambda t, n: (n, t, 0, 0)),
        ),
        compiler_params=pltpu.CompilerParams(
            dimension_semantics=("parallel", "parallel"),
            vmem_limit_bytes=int(budget),
        ),
    )(*in_arrays)

    out = out.reshape(N, Ho, Wo, P)
    if P != P0:
        out = out[..., :P0]
    return out


def basic_block_forward(x_nchw, params, stride=1, row_tile=None):
    """NCHW wrapper matching the PyTorch module's interface."""
    x = jnp.transpose(x_nchw, (0, 2, 3, 1))
    out = basic_block_forward_nhwc(x, params, stride=stride, row_tile=row_tile)
    return jnp.transpose(out, (0, 3, 1, 2))


def init_params(key, in_planes, planes, stride):
    """Deterministic synthetic parameters; BN folded to eval-mode scale/bias."""
    ks = jax.random.split(key, 16)

    def bn(k0, k1, k2, k3, c):
        gamma = 1.0 + 0.1 * jax.random.normal(k0, (c,), jnp.float32)
        beta = 0.1 * jax.random.normal(k1, (c,), jnp.float32)
        mean = 0.1 * jax.random.normal(k2, (c,), jnp.float32)
        var = jax.random.uniform(k3, (c,), jnp.float32, 0.5, 1.5)
        scale = gamma / jnp.sqrt(var + 1e-5)
        bias = beta - mean * scale
        return scale[None, :], bias[None, :]

    p = {}
    p["w1"] = 0.2 * jax.random.normal(ks[0], (in_planes, planes), jnp.float32)
    p["s1"], p["b1"] = bn(ks[1], ks[2], ks[3], ks[4], planes)
    p["w2"] = 0.2 * jax.random.normal(ks[5], (3, 3, planes, planes), jnp.float32)
    p["s2"], p["b2"] = bn(ks[6], ks[7], ks[8], ks[9], planes)
    p["w3"] = 0.2 * jax.random.normal(ks[10], (planes, planes), jnp.float32)
    if stride != 1:
        p["wds"] = 0.2 * jax.random.normal(ks[11], (in_planes, planes), jnp.float32)
        p["sds"], p["bds"] = bn(ks[12], ks[13], ks[14], ks[15], planes)
    return p


def ref_forward(x_nchw, params, stride):
    """Pure-JAX reference (matches PyTorch eval-mode BasicBlock)."""
    x = jnp.transpose(x_nchw, (0, 2, 3, 1))
    dn = ("NHWC", "HWIO", "NHWC")

    def conv(inp, w, s, pad):
        return lax.conv_general_dilated(inp, w, (s, s), pad, dimension_numbers=dn)

    y = conv(x, params["w1"][None, None], stride, "VALID")
    y = jnp.maximum(y * params["s1"][0] + params["b1"][0], 0.0)
    y = conv(y, params["w2"], 1, ((1, 1), (1, 1)))
    y = jnp.maximum(y * params["s2"][0] + params["b2"][0], 0.0)
    y = conv(y, params["w3"][None, None], 1, "VALID")
    if stride != 1:
        xr = conv(x, params["wds"][None, None], stride, "VALID")
        xr = xr * params["sds"][0] + params["bds"][0]
    else:
        xr = x
    out = jnp.maximum(xr + y, 0.0)
    return jnp.transpose(out, (0, 3, 1, 2))


if __name__ == "__main__":
    key = jax.random.PRNGKey(0)
    kx1, kx2, kp1, kp2 = jax.random.split(key, 4)

    # Case 1: stride=1 (identity residual), 4 row tiles of 4 rows each.
    x1 = jax.random.normal(kx1, (2, 8, 16, 16), jnp.float32)   # NCHW
    p1 = init_params(kp1, 8, 8, stride=1)
    ref1 = ref_forward(x1, p1, 1)
    out1 = jax.block_until_ready(basic_block_forward(x1, p1, stride=1, row_tile=4))
    np.testing.assert_allclose(np.asarray(out1), np.asarray(ref1), atol=5e-4, rtol=5e-4)

    # Same case with the auto-chosen (VMEM-budget-driven) row tile.
    out1b = jax.block_until_ready(basic_block_forward(x1, p1, stride=1))
    np.testing.assert_allclose(np.asarray(out1b), np.asarray(ref1), atol=5e-4, rtol=5e-4)

    # Case 2: stride=2 (fused downsample 1x1 conv + BN branch), 4 row tiles of 2 rows.
    x2 = jax.random.normal(kx2, (2, 4, 16, 16), jnp.float32)   # NCHW
    p2 = init_params(kp2, 4, 8, stride=2)
    out2 = jax.block_until_ready(basic_block_forward(x2, p2, stride=2, row_tile=2))
    np.testing.assert_allclose(np.asarray(out2), np.asarray(ref_forward(x2, p2, 2)),
                               atol=5e-4, rtol=5e-4)

    # bf16 input path: matmuls run on the bf16 MXU path with f32 accumulation.
    out1_bf16 = jax.block_until_ready(
        basic_block_forward(x1.astype(jnp.bfloat16), p1, stride=1, row_tile=4))
    np.testing.assert_allclose(np.asarray(out1_bf16.astype(jnp.float32)),
                               np.asarray(ref1), atol=1e-1, rtol=1e-1)

    print("KERNEL_OK")
</pallas_src>

<mosaic_0001>
module attributes {stable_mosaic.version = 11 : i64} {
  func.func @k(%arg0: memref<8x128xf32, #tpu.memory_space<vmem>>, %arg1: memref<8x128xf32, #tpu.memory_space<vmem>>) attributes {dimension_semantics = [], scalar_prefetch = 0 : i64, scratch_operands = 0 : i64, tpu.core_type = #tpu.core_type<tc>} {
    %c0 = arith.constant 0 : index
    %c0_0 = arith.constant 0 : index
    %0 = vector.load %arg0[%c0, %c0_0] : memref<8x128xf32, #tpu.memory_space<vmem>>, vector<8x128xf32>
    %c1_i32 = arith.constant 1 : i32
    %1 = tpu.dynamic_rotate %0 by %c1_i32 dim 0 : vector<8x128xf32>, i32 -> vector<8x128xf32>
    %c0_1 = arith.constant 0 : index
    %c0_2 = arith.constant 0 : index
    %2 = vector.load %arg1[%c0_1, %c0_2] : memref<8x128xf32, #tpu.memory_space<vmem>>, vector<8x128xf32>
    tpu.vector_store %arg1[%c0_1, %c0_2], %1 {strides = array<i32>} : memref<8x128xf32, #tpu.memory_space<vmem>>, vector<8x128xf32>,
    return
  }
}

</mosaic_0001>

<bundles_post_ra>
// kernel: tpu_custom_call.1
= control target key start
LH: loop header
LB: loop body
LE: loop exit
PB: predicated region body
PF: predicated region fallthrough
CT: control target
= control target key end

     0   :  { %6 = vsyncpa [#allocation3], 0  ;;  %s125_s0 = inlined_call_operand.hbm [shape: f32[8,128], index: 0, kind: input, shape index: {}]   ;;  %s126_s1 = inlined_call_operand.hbm [shape: f32[8,128], index: 1, kind: output, shape index: {}]  }
   0x1   :  { %7 = vsyncpa [#allocation4], 0  ;;  %s89_s6 = smov [#allocation2]   ;;  %s41_s10 = scalar_lea.hbm %s125_s0, 128 }
   0x2   :  { %s14_s7 = sshll.u32 %s89_s6, 4  ;;  %p42_p0 = scmp.ne.s32.totalorder %s125_s0, %s41_s10  ;;  %s15_s7 = int_to_ptr.vmem [resolvable:$true] %s14_s7 }
   0x3   :  { %p45_p1 = scmp.lt.u32.totalorder %s41_s10, %s125_s0 }
   0x5   :  { %p47_p2 = pnand %p45_p1, %p42_p0 }
   0x7   :  { %50 = shalt.err (!%p47_p2)
}
   0x8   :  { %s51_s15 = scalar_lea.vmem %s15_s7, 128  ;;  %p56_p4 = scmp.lt.s32.totalorder %s15_s7, %s15_s7 }
   0x9   :  { %p52_p3 = scmp.ne.s32.totalorder %s15_s7, %s51_s15  ;;  %p57_p5 = scmp.lt.s32.totalorder %s51_s15, %s51_s15 }
   0xb   :  { %p58_p6 = por %p57_p5, %p56_p4 }
   0xd   :  { %p59_p7 = pnand %p58_p6, %p52_p3 }
   0xf   :  { %62 = shalt.err (!%p59_p7)
}
  0x10   :  { %17 = dma.hbm_to_vmem [thread:$0]  %s125_s0, 128, %s15_s7, [#allocation3]  }
  0x11   :  { %85 = dma.done.wait [#allocation3], 128  }
  0x12   :  { %86 = vsyncadd [#allocation3], 4294967168  ;;  %s90_s18 = smov [#allocation5]   ;;  %v21_v0 = vld [vmem:[#allocation2] sm:$0xff] }
  0x13   :  { %s30_s19 = sshll.u32 %s90_s18, 4  ;;  %v22_v1 = vrot.slane %v21_v0, 7  ;;  %s31_s19 = int_to_ptr.vmem [resolvable:$true] %s30_s19 }
  0x14   :  { %s63_s20 = scalar_lea.vmem %s31_s19, 128  ;;  %p68_p9 = scmp.lt.s32.totalorder %s31_s19, %s31_s19 }
  0x15   :  { %23 = vst [vmem:[#allocation5] sm:$0xff] %v22_v1  ;;  %p64_p8 = scmp.ne.s32.totalorder %s31_s19, %s63_s20  ;;  %p69_p10 = scmp.lt.s32.totalorder %s63_s20, %s63_s20 }
  0x17   :  { %p70_p11 = por %p69_p10, %p68_p9 }
  0x19   :  { %p71_p12 = pnand %p70_p11, %p64_p8 }
  0x1b   :  { %74 = shalt.err (!%p71_p12)
}
  0x1c   :  { %s75_s23 = scalar_lea.hbm %s126_s1, 128 }
  0x1d   :  { %p76_p13 = scmp.ne.s32.totalorder %s126_s1, %s75_s23  ;;  %p79_p0 = scmp.lt.u32.totalorder %s75_s23, %s126_s1 }
  0x1f   :  { %p81_p1 = pnand %p79_p0, %p76_p13 }
  0x21   :  { %84 = shalt.err (!%p81_p1)
}
  0x22   :  { %33 = dma.vmem_to_hbm [thread:$0]  %s31_s19, 128, %s126_s1, [#allocation4]  }
  0x23   :  { %87 = dma.done.wait [#allocation4], 128  }
  0x24   :  { %88 = vsyncadd [#allocation4], 4294967168 }
  0x25   :  { %37 = vsyncpa [#allocation3], 1 }
  0x26   :  { %38 = vsyncpa [#allocation4], 1 }

</bundles_post_ra>
